<compile_context>
chip_gen: v6e
topology: v6e:2x2x1
jax: 0.10.0
libtpu: 0.0.40
codegen_flags: <defaults>
</compile_context>

<pallas_src>
import math

import jax
import jax.numpy as jnp
from jax.experimental import pallas as pl
from jax.experimental.pallas import tpu as pltpu


HIDDEN = 256


def _round_up(x, m):
    return ((x + m - 1) // m) * m


def qnet_kernel(s_ref, a_ref, w1s_ref, w1a_ref, b1_ref, w2_ref, b2_ref,
                w3_ref, b3_ref, o_ref):
    # Layer 1: concat(state, action) @ W1 expressed as two bf16 MXU matmuls, f32 accumulation.
    h1 = jnp.dot(s_ref[...], w1s_ref[...], preferred_element_type=jnp.float32)
    h1 = h1 + jnp.dot(a_ref[...], w1a_ref[...], preferred_element_type=jnp.float32)
    h1 = jnp.maximum(h1 + b1_ref[...], 0.0)                          # bias + ReLU in f32 (VPU)

    # Layer 2: bf16 MXU matmul, f32 accumulation.
    h2 = jnp.dot(h1.astype(jnp.bfloat16), w2_ref[...],
                 preferred_element_type=jnp.float32)
    h2 = jnp.maximum(h2 + b2_ref[...], 0.0)

    # Layer 3 (256 -> 1): VPU multiply + lane reduction instead of an N=1 MXU pass.
    w3_row = w3_ref[...].astype(jnp.float32)                         # (1, H)
    q = jnp.sum(h2 * w3_row, axis=-1, keepdims=True) + b3_ref[...]   # (TB, 1)
    o_ref[...] = q.astype(o_ref.dtype)


def qnetwork_forward(state, action, params, *, max_block_b=128):
    """Pallas forward pass of QNetwork. state: (B, S), action: (B, A) -> (B, 1)."""
    w1s, w1a, b1, w2, b2, w3_row, b3 = params
    B, S = state.shape
    _, A = action.shape
    H = w2.shape[0]

    # Batch tile: multiple of 8 (sublane), capped at max_block_b; pad batch to a tile multiple.
    TB = min(max_block_b, _round_up(B, 8))
    B_pad = _round_up(B, TB)
    if B_pad != B:
        pad = B_pad - B
        state = jnp.pad(state, ((0, pad), (0, 0)))
        action = jnp.pad(action, ((0, pad), (0, 0)))

    state = state.astype(jnp.bfloat16)
    action = action.astype(jnp.bfloat16)

    grid = (B_pad // TB,)
    const = lambda shape: pl.BlockSpec(shape, lambda i: (0, 0))  # VMEM-resident across batch tiles

    out = pl.pallas_call(
        qnet_kernel,
        out_shape=jax.ShapeDtypeStruct((B_pad, 1), jnp.float32),
        grid_spec=pltpu.PrefetchScalarGridSpec(
            num_scalar_prefetch=0,
            grid=grid,
            in_specs=[
                pl.BlockSpec((TB, S), lambda i: (i, 0)),   # state tile
                pl.BlockSpec((TB, A), lambda i: (i, 0)),   # action tile
                const((S, H)),                             # W1_s (bf16)
                const((A, H)),                             # W1_a (bf16)
                const((1, H)),                             # b1 (f32)
                const((H, H)),                             # W2 (bf16)
                const((1, H)),                             # b2 (f32)
                const((1, H)),                             # w3 row (bf16)
                const((1, 1)),                             # b3 (f32)
            ],
            out_specs=pl.BlockSpec((TB, 1), lambda i: (i, 0)),
        ),
        compiler_params=pltpu.CompilerParams(
            dimension_semantics=("parallel",),             # shards batch tiles across TCs on v7x
        ),
    )(state, action, w1s, w1a, b1, w2, b2, w3_row, b3)

    return out[:B]


def xavier_uniform(key, fan_in, fan_out):
    # matches torch.nn.init.xavier_uniform_ (gain=1)
    limit = math.sqrt(6.0 / (fan_in + fan_out))
    return jax.random.uniform(key, (fan_in, fan_out), jnp.float32, -limit, limit)


def init_qnetwork_params(key, state_dim, action_dim):
    """Weights stored bf16 (MXU-native, half the HBM traffic); biases stay f32."""
    d_in = state_dim + action_dim
    k1, k2, k3 = jax.random.split(key, 3)
    w1 = xavier_uniform(k1, d_in, HIDDEN)
    w2 = xavier_uniform(k2, HIDDEN, HIDDEN)
    w3 = xavier_uniform(k3, HIDDEN, 1)

    w1s = w1[:state_dim].astype(jnp.bfloat16)              # (S, H)
    w1a = w1[state_dim:].astype(jnp.bfloat16)              # (A, H)
    b1 = jnp.zeros((1, HIDDEN), jnp.float32)
    b2 = jnp.zeros((1, HIDDEN), jnp.float32)
    w3_row = w3.T.astype(jnp.bfloat16)                     # (1, H) lane-dense row
    b3 = jnp.zeros((1, 1), jnp.float32)
    return (w1s, w1a, b1, w2.astype(jnp.bfloat16), b2, w3_row, b3)


def qnetwork_reference(state, action, params):
    """Pure-JAX reference with the same bf16-input / f32-accumulation math."""
    w1s, w1a, b1, w2, b2, w3_row, b3 = params
    s = state.astype(jnp.bfloat16)
    a = action.astype(jnp.bfloat16)
    h1 = jnp.dot(s, w1s, preferred_element_type=jnp.float32) \
        + jnp.dot(a, w1a, preferred_element_type=jnp.float32)
    h1 = jnp.maximum(h1 + b1, 0.0)
    h2 = jnp.dot(h1.astype(jnp.bfloat16), w2, preferred_element_type=jnp.float32)
    h2 = jnp.maximum(h2 + b2, 0.0)
    return jnp.sum(h2 * w3_row.astype(jnp.float32), axis=-1, keepdims=True) + b3


if __name__ == "__main__":
    key = jax.random.PRNGKey(0)
    kp, ks, ka = jax.random.split(key, 3)

    batch = 8
    state_dim = 32     # input_dim[0]
    action_dim = 4

    params = init_qnetwork_params(kp, state_dim, action_dim)
    state = jax.random.normal(ks, (batch, state_dim), jnp.float32)
    action = jax.random.normal(ka, (batch, action_dim), jnp.float32)

    q = qnetwork_forward(state, action, params)
    q = jax.block_until_ready(q)

    q_ref = qnetwork_reference(state, action, params)
    assert q.shape == (batch, 1)
    assert jnp.allclose(q, q_ref, atol=5e-3, rtol=5e-3), "mismatch vs reference"

    print("KERNEL_OK")
</pallas_src>

<mosaic_0001>
module attributes {stable_mosaic.version = 11 : i64} {
  func.func @qnet_kernel(%arg0: i32, %arg1: memref<8x32xbf16, #tpu.memory_space<vmem>>, %arg2: memref<8x4xbf16, #tpu.memory_space<vmem>>, %arg3: memref<32x256xbf16, #tpu.memory_space<vmem>>, %arg4: memref<4x256xbf16, #tpu.memory_space<vmem>>, %arg5: memref<1x256xf32, #tpu.memory_space<vmem>>, %arg6: memref<256x256xbf16, #tpu.memory_space<vmem>>, %arg7: memref<1x256xf32, #tpu.memory_space<vmem>>, %arg8: memref<1x256xbf16, #tpu.memory_space<vmem>>, %arg9: memref<1x1xf32, #tpu.memory_space<vmem>>, %arg10: memref<8x1xf32, #tpu.memory_space<vmem>>) attributes {dimension_semantics = [#tpu.dimension_semantics<parallel>], iteration_bounds = array<i64: 1>, scalar_prefetch = 0 : i64, scratch_operands = 0 : i64, tpu.core_type = #tpu.core_type<tc>, window_params = [{transform_indices = @transform_0, window_bounds = array<i64: 8, 32>}, {transform_indices = @transform_1, window_bounds = array<i64: 8, 4>}, {pipeline_mode = #tpu.pipeline_mode<synchronous>, transform_indices = @transform_2, window_bounds = array<i64: 32, 256>}, {pipeline_mode = #tpu.pipeline_mode<synchronous>, transform_indices = @transform_3, window_bounds = array<i64: 4, 256>}, {pipeline_mode = #tpu.pipeline_mode<synchronous>, transform_indices = @transform_4, window_bounds = array<i64: 1, 256>}, {pipeline_mode = #tpu.pipeline_mode<synchronous>, transform_indices = @transform_5, window_bounds = array<i64: 256, 256>}, {pipeline_mode = #tpu.pipeline_mode<synchronous>, transform_indices = @transform_6, window_bounds = array<i64: 1, 256>}, {pipeline_mode = #tpu.pipeline_mode<synchronous>, transform_indices = @transform_7, window_bounds = array<i64: 1, 256>}, {pipeline_mode = #tpu.pipeline_mode<synchronous>, transform_indices = @transform_8, window_bounds = array<i64: 1, 1>}, {transform_indices = @transform_9, window_bounds = array<i64: 8, 1>}]} {
    %c0 = arith.constant 0 : index
    %c0_0 = arith.constant 0 : index
    %0 = vector.load %arg1[%c0, %c0_0] : memref<8x32xbf16, #tpu.memory_space<vmem>>, vector<8x32xbf16>
    %c0_1 = arith.constant 0 : index
    %c0_2 = arith.constant 0 : index
    %1 = vector.load %arg3[%c0_1, %c0_2] : memref<32x256xbf16, #tpu.memory_space<vmem>>, vector<32x256xbf16>
    %cst = arith.constant dense<0.000000e+00> : vector<8x256xf32>
    %2 = tpu.matmul %0, %1, %cst {dimension_numbers = #tpu.dot_dimension_numbers<[1], [0], [0], [1], [0, 0, 1, 1], [], []>} : vector<8x32xbf16>, vector<32x256xbf16>, vector<8x256xf32> -> vector<8x256xf32>
    %c0_3 = arith.constant 0 : index
    %c0_4 = arith.constant 0 : index
    %3 = vector.load %arg2[%c0_3, %c0_4] : memref<8x4xbf16, #tpu.memory_space<vmem>>, vector<8x4xbf16>
    %c0_5 = arith.constant 0 : index
    %c0_6 = arith.constant 0 : index
    %4 = vector.load %arg4[%c0_5, %c0_6] : memref<4x256xbf16, #tpu.memory_space<vmem>>, vector<4x256xbf16>
    %cst_7 = arith.constant dense<0.000000e+00> : vector<8x256xf32>
    %5 = tpu.matmul %3, %4, %cst_7 {dimension_numbers = #tpu.dot_dimension_numbers<[1], [0], [0], [1], [0, 0, 1, 1], [], []>} : vector<8x4xbf16>, vector<4x256xbf16>, vector<8x256xf32> -> vector<8x256xf32>
    %6 = arith.addf %2, %5 : vector<8x256xf32>
    %c0_8 = arith.constant 0 : index
    %c0_9 = arith.constant 0 : index
    %7 = vector.load %arg5[%c0_8, %c0_9] : memref<1x256xf32, #tpu.memory_space<vmem>>, vector<1x256xf32>
    %8 = vector.broadcast %7 : vector<1x256xf32> to vector<8x256xf32>
    %9 = arith.addf %6, %8 : vector<8x256xf32>
    %cst_10 = arith.constant 0.000000e+00 : f32
    %10 = vector.broadcast %cst_10 : f32 to vector<8x256xf32>
    %11 = arith.maximumf %9, %10 : vector<8x256xf32>
    %12 = arith.truncf %11 : vector<8x256xf32> to vector<8x256xbf16>
    %c0_11 = arith.constant 0 : index
    %c0_12 = arith.constant 0 : index
    %13 = vector.load %arg6[%c0_11, %c0_12] : memref<256x256xbf16, #tpu.memory_space<vmem>>, vector<256x256xbf16>
    %cst_13 = arith.constant dense<0.000000e+00> : vector<8x256xf32>
    %14 = tpu.matmul %12, %13, %cst_13 {dimension_numbers = #tpu.dot_dimension_numbers<[1], [0], [0], [1], [0, 0, 1, 1], [], []>} : vector<8x256xbf16>, vector<256x256xbf16>, vector<8x256xf32> -> vector<8x256xf32>
    %c0_14 = arith.constant 0 : index
    %c0_15 = arith.constant 0 : index
    %15 = vector.load %arg7[%c0_14, %c0_15] : memref<1x256xf32, #tpu.memory_space<vmem>>, vector<1x256xf32>
    %16 = vector.broadcast %15 : vector<1x256xf32> to vector<8x256xf32>
    %17 = arith.addf %14, %16 : vector<8x256xf32>
    %cst_16 = arith.constant 0.000000e+00 : f32
    %18 = vector.broadcast %cst_16 : f32 to vector<8x256xf32>
    %19 = arith.maximumf %17, %18 : vector<8x256xf32>
    %c0_17 = arith.constant 0 : index
    %c0_18 = arith.constant 0 : index
    %20 = vector.load %arg8[%c0_17, %c0_18] : memref<1x256xbf16, #tpu.memory_space<vmem>>, vector<1x256xbf16>
    %21 = arith.extf %20 : vector<1x256xbf16> to vector<1x256xf32>
    %22 = vector.broadcast %21 : vector<1x256xf32> to vector<8x256xf32>
    %23 = arith.mulf %19, %22 : vector<8x256xf32>
    %cst_19 = arith.constant dense<0.000000e+00> : vector<8xf32>
    %24 = vector.multi_reduction <add>, %23, %cst_19 [1] : vector<8x256xf32> to vector<8xf32>
    %25 = vector.shape_cast %24 : vector<8xf32> to vector<8x1xf32>
    %c0_20 = arith.constant 0 : index
    %c0_21 = arith.constant 0 : index
    %26 = vector.load %arg9[%c0_20, %c0_21] : memref<1x1xf32, #tpu.memory_space<vmem>>, vector<1x1xf32>
    %27 = vector.broadcast %26 : vector<1x1xf32> to vector<8x1xf32>
    %28 = arith.addf %25, %27 : vector<8x1xf32>
    %c0_22 = arith.constant 0 : index
    %c0_23 = arith.constant 0 : index
    %29 = vector.load %arg10[%c0_22, %c0_23] : memref<8x1xf32, #tpu.memory_space<vmem>>, vector<8x1xf32>
    tpu.vector_store %arg10[%c0_22, %c0_23], %28 {strides = array<i32>} : memref<8x1xf32, #tpu.memory_space<vmem>>, vector<8x1xf32>,
    return
  }
  func.func @transform_0(%arg0: i32) -> (i32, i32) {
    %c0_i32 = arith.constant 0 : i32
    %c0_i32_0 = arith.constant 0 : i32
    return %arg0, %c0_i32 : i32, i32
  }
  func.func @transform_1(%arg0: i32) -> (i32, i32) {
    %c0_i32 = arith.constant 0 : i32
    %c0_i32_0 = arith.constant 0 : i32
    return %arg0, %c0_i32 : i32, i32
  }
  func.func @transform_2(%arg0: i32) -> (i32, i32) {
    %c0_i32 = arith.constant 0 : i32
    %c0_i32_0 = arith.constant 0 : i32
    %c0_i32_1 = arith.constant 0 : i32
    return %c0_i32, %c0_i32_0 : i32, i32
  }
  func.func @transform_3(%arg0: i32) -> (i32, i32) {
    %c0_i32 = arith.constant 0 : i32
    %c0_i32_0 = arith.constant 0 : i32
    %c0_i32_1 = arith.constant 0 : i32
    return %c0_i32, %c0_i32_0 : i32, i32
  }
  func.func @transform_4(%arg0: i32) -> (i32, i32) {
    %c0_i32 = arith.constant 0 : i32
    %c0_i32_0 = arith.constant 0 : i32
    %c0_i32_1 = arith.constant 0 : i32
    return %c0_i32, %c0_i32_0 : i32, i32
  }
  func.func @transform_5(%arg0: i32) -> (i32, i32) {
    %c0_i32 = arith.constant 0 : i32
    %c0_i32_0 = arith.constant 0 : i32
    %c0_i32_1 = arith.constant 0 : i32
    return %c0_i32, %c0_i32_0 : i32, i32
  }
  func.func @transform_6(%arg0: i32) -> (i32, i32) {
    %c0_i32 = arith.constant 0 : i32
    %c0_i32_0 = arith.constant 0 : i32
    %c0_i32_1 = arith.constant 0 : i32
    return %c0_i32, %c0_i32_0 : i32, i32
  }
  func.func @transform_7(%arg0: i32) -> (i32, i32) {
    %c0_i32 = arith.constant 0 : i32
    %c0_i32_0 = arith.constant 0 : i32
    %c0_i32_1 = arith.constant 0 : i32
    return %c0_i32, %c0_i32_0 : i32, i32
  }
  func.func @transform_8(%arg0: i32) -> (i32, i32) {
    %c0_i32 = arith.constant 0 : i32
    %c0_i32_0 = arith.constant 0 : i32
    %c0_i32_1 = arith.constant 0 : i32
    return %c0_i32, %c0_i32_0 : i32, i32
  }
  func.func @transform_9(%arg0: i32) -> (i32, i32) {
    %c0_i32 = arith.constant 0 : i32
    %c0_i32_0 = arith.constant 0 : i32
    return %arg0, %c0_i32 : i32, i32
  }
}

</mosaic_0001>

<bundles_post_ra>
// kernel: tpu_custom_call.1
= control target key start
LH: loop header
LB: loop body
LE: loop exit
PB: predicated region body
PF: predicated region fallthrough
CT: control target
= control target key end

     0   :  { %s732_s0 = inlined_call_operand.vmem [shape: bf16[8,32], index: 0, kind: input, shape index: {}]   ;;  %s733_s1 = inlined_call_operand.vmem [shape: bf16[8,4], index: 1, kind: input, shape index: {}]   ;;  %s734_s2 = inlined_call_operand.hbm [shape: bf16[32,256], index: 2, kind: input, shape index: {}]   ;;  %s735_s3 = inlined_call_operand.vmem [shape: bf16[4,256], index: 3, kind: input, shape index: {}]   ;;  %s736_s4 = inlined_call_operand.vmem [shape: f32[1,256], index: 4, kind: input, shape index: {}]   ;;  %s737_s5 = inlined_call_operand.hbm [shape: bf16[256,256], index: 5, kind: input, shape index: {}]   ;;  %s738_s6 = inlined_call_operand.vmem [shape: f32[1,256], index: 6, kind: input, shape index: {}]   ;;  %s739_s7 = inlined_call_operand.vmem [shape: bf16[1,256], index: 7, kind: input, shape index: {}]   ;;  %s740_s8 = inlined_call_operand.<no memory space> [shape: f32[1,1], index: 8, kind: input, shape index: {}]   ;;  %s741_s9 = inlined_call_operand.vmem [shape: f32[8,1], index: 9, kind: output, shape index: {}]  }
   0x1   :  { %v14_v0 = vstv %s740_s8 }
   0x2   :  { %15 = vst [vmem:[#allocation2] sm:$0x1] %v14_v0 }
   0x3   :  { %16 = vsyncpa [#allocation4], 0 }
   0x4   :  { %17 = vsyncpa [#allocation6], 0  ;;  %s647_s11 = smov [#allocation3]  }
   0x5   :  { %s27_s12 = sshll.u32 %s647_s11, 4  ;;  %s28_s12 = int_to_ptr.vmem [resolvable:$true] %s27_s12 }
   0x6   :  { %s611_s13 = scalar_lea.vmem %s28_s12, 512  ;;  %p616_p1 = scmp.lt.s32.totalorder %s28_s12, %s28_s12 }
   0x7   :  { %p612_p0 = scmp.ne.s32.totalorder %s28_s12, %s611_s13  ;;  %p617_p2 = scmp.lt.s32.totalorder %s611_s13, %s611_s13 }
   0x9   :  { %p618_p3 = por %p617_p2, %p616_p1 }
   0xb   :  { %p619_p4 = pnand %p618_p3, %p612_p0 }
   0xd   :  { %622 = shalt.err (!%p619_p4)
}
   0xe   :  { %s648_s14 = smov 128   ;;  %s649_s15 = smov 8  }
   0xf   :  { %33 = dma.hbm_to_vmem [thread:$0]  %s734_s2, 512, %s28_s12, [#allocation4], %s648_s14, %s648_s14, %s649_s15  }
  0x10   :  { %s650_s8 = smov [#allocation5]  }
  0x11   :  { %s43_s18 = sshll.u32 %s650_s8, 4  ;;  %s44_s18 = int_to_ptr.vmem [resolvable:$true] %s43_s18 }
  0x12   :  { %s631_s19 = scalar_lea.vmem %s44_s18, 4096  ;;  %p636_p6 = scmp.lt.s32.totalorder %s44_s18, %s44_s18 }
  0x13   :  { %p632_p5 = scmp.ne.s32.totalorder %s44_s18, %s631_s19  ;;  %p637_p7 = scmp.lt.s32.totalorder %s631_s19, %s631_s19 }
  0x15   :  { %p638_p8 = por %p637_p7, %p636_p6 }
  0x17   :  { %p639_p9 = pnand %p638_p8, %p632_p5 }
  0x19   :  { %642 = shalt.err (!%p639_p9)
}
  0x1a   :  { %49 = dma.hbm_to_vmem [thread:$0]  %s737_s5, 4096, %s44_s18, [#allocation6], %s648_s14, %s648_s14, %s649_s15  }
  0x1b   :  { %643 = dma.done.wait [#allocation4], 512  }
  0x1c   :  { %644 = vsyncadd [#allocation4], 4294966784 }
  0x1d   :  { %645 = dma.done.wait [#allocation6], 4096  }
  0x1e   :  { %646 = vsyncadd [#allocation6], 4294963200  ;;  %v651_v1 = vmov 0   ;;  %vm83_vm0 = vcmask 1041408   ;;  %v551_v5 = vld [vmem:[#allocation3 + $0x14] ss:$8 sps:$4 sm:$0xff]   ;;  %v198_v43 = vlaneseq }
  0x1f   :  { %122 = vmatprep.mubr.bf16.mxu1 %v651_v1  ;;  %v503_v2 = vld.sshfl [vmem:[%s735_s3] sm:$0x33 pattern:$0x76325410]  ;;  %v549_v7 = vld [vmem:[#allocation3 + $0x10] ss:$8 sps:$4 sm:$0xff]  }
  0x20   :  { %v78_v3 = vcombine.high %v503_v2, %v503_v2  ;;  %v85_v4 = vsel %vm83_vm0, %v503_v2, 0  ;;  %v68_v6 = vld [vmem:[%s733_s1] sm:$0xf]  ;;  %v554_v8 = vld [vmem:[#allocation3 + $0x4] ss:$8 sps:$4 sm:$0xff]   ;;  %vm79_vm1 = vcmask 31744  }
  0x21   :  { %v555_v9 = vld [vmem:[#allocation5 + $0x74] ss:$8 sps:$4 sm:$0xff]   ;;  %v557_v10 = vld [vmem:[#allocation5 + $0x70] ss:$8 sps:$4 sm:$0xff]   ;;  %v558_v11 = vld [vmem:[#allocation5 + $0x64] ss:$8 sps:$4 sm:$0xff]  }
  0x22   :  { %504 = vmatprep.subr.msk.bf16.mxu1 %vm83_vm0, %v78_v3  ;;  %418 = vmatprep.subr.bf16.mxu0 %v555_v9  ;;  %v552_v12 = vld [vmem:[#allocation3] ss:$8 sps:$4 sm:$0xff]   ;;  %v561_v14 = vld [vmem:[#allocation5 + $0x54] ss:$8 sps:$4 sm:$0xff]   ;;  %v563_v16 = vld [vmem:[#allocation5 + $0x50] ss:$8 sps:$4 sm:$0xff]  }
  0x23   :  { %105 = vmatpush1.bf16.msra.mxu1 %v85_v4  ;;  %419 = vmatpush1.bf16.msra.mxu0 %v557_v10  ;;  %v560_v13 = vld [vmem:[#allocation5 + $0x60] ss:$8 sps:$4 sm:$0xff]   ;;  %vm151_vm2 = vcmask 261120   ;;  %v564_v17 = vld [vmem:[#allocation5 + $0x44] ss:$8 sps:$4 sm:$0xff]   ;;  %v199_v44 = vshrl.u32 %v198_v43, 7 }
  0x24   :  { %167 = vmatprep.subr.bf16.mxu1 %v551_v5  ;;  %420 = vmatprep.subr.bf16.mxu0 %v558_v11  ;;  %v63_v15 = vld [vmem:[%s732_s0] sm:$0xf]  ;;  %v569_v20 = vld [vmem:[#allocation5 + $0x30] ss:$8 sps:$4 sm:$0xff]   ;;  %v570_v21 = vld [vmem:[#allocation5 + $0x24] ss:$8 sps:$4 sm:$0xff]  }
  0x25   :  { %v566_v18 = vld [vmem:[#allocation5 + $0x40] ss:$8 sps:$4 sm:$0xff]   ;;  %v567_v19 = vld [vmem:[#allocation5 + $0x34] ss:$8 sps:$4 sm:$0xff]   ;;  %v575_v24 = vld [vmem:[#allocation5 + $0x10] ss:$8 sps:$4 sm:$0xff]  }
  0x26   :  { %505 = vmatmul.mubr.msk.bf16.vlgmr.msra.gmra.mxu1 %vm79_vm1, %v68_v6  ;;  %v572_v22 = vld [vmem:[#allocation5 + $0x20] ss:$8 sps:$4 sm:$0xff]   ;;  %v573_v23 = vld [vmem:[#allocation5 + $0x14] ss:$8 sps:$4 sm:$0xff]   ;;  %v576_v25 = vld [vmem:[#allocation5 + $0x4] ss:$8 sps:$4 sm:$0xff]  }
  0x27   :  { %168 = vmatpush1.bf16.msra.mxu1 %v549_v7  ;;  %187 = vmatprep.mubr.bf16.mxu1 %v651_v1  ;;  %v578_v26 = vld [vmem:[#allocation5] ss:$8 sps:$4 sm:$0xff]   ;;  %v579_v27 = vld [vmem:[#allocation5 + $0xf4] ss:$8 sps:$4 sm:$0xff]   ;;  %v581_v28 = vld [vmem:[#allocation5 + $0xf0] ss:$8 sps:$4 sm:$0xff]  }
  0x28   :  { %169 = vmatprep.subr.bf16.mxu1 %v554_v8  ;;  %421 = vmatpush1.bf16.msra.mxu0 %v560_v13  ;;  %v582_v29 = vld [vmem:[#allocation5 + $0xe4] ss:$8 sps:$4 sm:$0xff]   ;;  %v584_v30 = vld [vmem:[#allocation5 + $0xe0] ss:$8 sps:$4 sm:$0xff]   ;;  %v585_v31 = vld [vmem:[#allocation5 + $0xd4] ss:$8 sps:$4 sm:$0xff]  }
  0x29   :  { %422 = vmatprep.subr.bf16.mxu0 %v561_v14  ;;  %v587_v32 = vld [vmem:[#allocation5 + $0xd0] ss:$8 sps:$4 sm:$0xff]   ;;  %v588_v33 = vld [vmem:[#allocation5 + $0xc4] ss:$8 sps:$4 sm:$0xff]   ;;  %v590_v34 = vld [vmem:[#allocation5 + $0xc0] ss:$8 sps:$4 sm:$0xff]  }
  0x2a   :  { %v591_v35 = vld [vmem:[#allocation5 + $0xb4] ss:$8 sps:$4 sm:$0xff]   ;;  %v593_v36 = vld [vmem:[#allocation5 + $0xb0] ss:$8 sps:$4 sm:$0xff]   ;;  %v594_v37 = vld [vmem:[#allocation5 + $0xa4] ss:$8 sps:$4 sm:$0xff]  }
  0x2b   :  { %170 = vmatpush1.bf16.msra.mxu1 %v552_v12  ;;  %v596_v38 = vld [vmem:[#allocation5 + $0xa0] ss:$8 sps:$4 sm:$0xff]   ;;  %v597_v39 = vld [vmem:[#allocation5 + $0x94] ss:$8 sps:$4 sm:$0xff]   ;;  %v599_v40 = vld [vmem:[#allocation5 + $0x90] ss:$8 sps:$4 sm:$0xff]  }
  0x2c   :  { %423 = vmatpush1.bf16.msra.mxu0 %v563_v16  ;;  %v600_v41 = vld [vmem:[#allocation5 + $0x84] ss:$8 sps:$4 sm:$0xff]   ;;  %v602_v42 = vld [vmem:[#allocation5 + $0x80] ss:$8 sps:$4 sm:$0xff]   ;;  %v200_v47 = vsub.s32 0, %v199_v44  ;;  %v204_v50 = vsub.s32 1, %v199_v44 }
  0x2d   :  { %424 = vmatprep.subr.bf16.mxu0 %v564_v17  ;;  %v196_v49 = vld [vmem:[%s736_s4] sm:$0x3]  ;;  %v470_v5 = vsub.s32 2, %v199_v44  ;;  %vm495_vm3 = vcmask 7168  }
  0x2e   :  { %510 = vmatmul.mubr.msk.bf16.vlgmr.msra.gmra.mxu1 %vm151_vm2, %v63_v15  ;;  %v201_v52 = vrot.slane %v196_v49, %v200_v47  ;;  %v205_v55 = vrot.slane %v196_v49, %v204_v50  ;;  %v461_v2 = vld [vmem:[%s739_s7] sm:$0x3] }
  0x2f   :  { %v246_v3 = vld [vmem:[%s738_s6] sm:$0x3]  ;;  %v462_v4 = vunpack.c.l.bf16 %v461_v2 }
  0x30   :  { %425 = vmatpush1.bf16.msra.mxu0 %v566_v18  ;;  %v251_v6 = vrot.slane %v246_v3, %v200_v47  ;;  %v255_v7 = vrot.slane %v246_v3, %v204_v50 }
  0x31   :  { %426 = vmatprep.subr.bf16.mxu0 %v567_v19  ;;  %v467_v8 = vrot.slane %v462_v4, %v200_v47  ;;  %v471_v9 = vrot.slane %v462_v4, %v470_v5 }
  0x33   :  { %v477_v15 = vrot.slane %v467_v8, %v200_v47  ;;  %v481_v16 = vrot.slane %v471_v9, %v200_v47 }
  0x34   :  { %427 = vmatpush1.bf16.msra.mxu0 %v569_v20 }
  0x35   :  { %428 = vmatprep.subr.bf16.mxu0 %v570_v21 }
  0x38   :  { %429 = vmatpush1.bf16.msra.mxu0 %v572_v22 }
  0x39   :  { %430 = vmatprep.subr.bf16.mxu0 %v573_v23  ;;  %v543_v23 = vld [vmem:[#allocation2] ss:$0 sm:$0xff] }
  0x3c   :  { %431 = vmatpush1.bf16.msra.mxu0 %v575_v24 }
  0x3d   :  { %432 = vmatprep.subr.bf16.mxu0 %v576_v25 }
  0x40   :  { %433 = vmatpush1.bf16.msra.mxu0 %v578_v26 }
  0x41   :  { %434 = vmatprep.subr.bf16.mxu0 %v579_v27 }
  0x44   :  { %435 = vmatpush2.bf16.msra.mxu0 %v581_v28 }
  0x45   :  { %436 = vmatprep.subr.bf16.mxu0 %v582_v29 }
  0x48   :  { %437 = vmatpush2.bf16.msra.mxu0 %v584_v30 }
  0x49   :  { %438 = vmatprep.subr.bf16.mxu0 %v585_v31 }
  0x4c   :  { %439 = vmatpush2.bf16.msra.mxu0 %v587_v32 }
  0x4d   :  { %440 = vmatprep.subr.bf16.mxu0 %v588_v33 }
  0x50   :  { %441 = vmatpush2.bf16.msra.mxu0 %v590_v34 }
  0x51   :  { %442 = vmatprep.subr.bf16.mxu0 %v591_v35 }
  0x54   :  { %443 = vmatpush2.bf16.msra.mxu0 %v593_v36 }
  0x55   :  { %444 = vmatprep.subr.bf16.mxu0 %v594_v37 }
  0x58   :  { %445 = vmatpush2.bf16.msra.mxu0 %v596_v38 }
  0x59   :  { %446 = vmatprep.subr.bf16.mxu0 %v597_v39 }
  0x5c   :  { %447 = vmatpush2.bf16.msra.mxu0 %v599_v40 }
  0x5d   :  { %448 = vmatprep.subr.bf16.mxu0 %v600_v41 }
  0x60   :  { %449 = vmatpush2.bf16.msra.mxu0 %v602_v42 }
  0xe6   :  { %v124_v45 = vpop.f32.mrf.mxu1 }
  0xe8   :  { %v126_v46 = vpop.f32.mrf.mxu1 }
  0xea   :  { %v128_v48 = vpop.f32.mrf.mxu1 }
  0xec   :  { %v129_v51 = vpop.f32.mrf.mxu1 }
  0xee   :  { %v189_v53 = vpop.f32.mrf.mxu1 }
  0xef   :  { %v190_v54 = vadd.f32 %v189_v53, %v124_v45 }
  0xf0   :  { %v191_v56 = vpop.f32.mrf.mxu1 }
  0xf1   :  { %v208_v57 = vadd.f32 %v201_v52, %v190_v54  ;;  %v192_v58 = vadd.f32 %v191_v56, %v126_v46 }
  0xf2   :  { %v193_v59 = vpop.f32.mrf.mxu1 }
  0xf3   :  { %v209_v60 = vadd.f32 %v205_v55, %v192_v58  ;;  %v210_v61 = vmax.f32 %v208_v57, 0.0 }
  0xf4   :  { %v194_v62 = vpop.f32.mrf.mxu1 }
  0xf5   :  { %v211_v63 = vmax.f32 %v209_v60, 0.0  ;;  %v212_v1 = vpack.c.bf16 %v210_v61, %v210_v61 }
  0xf7   :  { %v213_v0 = vpack.c.bf16 %v211_v63, %v211_v63 }
  0xf9   :  { %450 = vmatprep.mubr.bf16.mxu0 %v213_v0 }
  0xfa   :  { %451 = vmatmul.mubr.bf16.vlgmr.msra.gmra.mxu0 %v212_v1 }
 0x1ba   :  { %v452_v10 = vpop.f32.mrf.mxu0 }
 0x1bb   :  { %v453_v11 = vadd.f32 %v452_v10, %v251_v6 }
 0x1bc   :  { %v454_v12 = vpop.f32.mrf.mxu0 }
 0x1bd   :  { %v459_v13 = vmax.f32 %v453_v11, 0.0  ;;  %v455_v14 = vadd.f32 %v454_v12, %v255_v7 }
 0x1be   :  { %v456_v17 = vpop.f32.mrf.mxu0 }
 0x1bf   :  { %v460_v18 = vmax.f32 %v455_v14, 0.0  ;;  %v482_v20 = vmul.f32 %v477_v15, %v459_v13 }
 0x1c0   :  { %v457_v19 = vpop.f32.mrf.mxu0 }
 0x1c1   :  { %v483_v21 = vmul.f32 %v481_v16, %v460_v18 }
 0x1c3   :  { %v484_v22 = vadd.f32 %v483_v21, %v482_v20 }
 0x1c5   :  { %485 = vadd.xlane.f32.xlu0 %v484_v22 }
 0x24e   :  { %v486_v24 = vpop.xlane.xlu0 %485 }
 0x24f   :  { %v494_v25 = vadd.f32 %v543_v23, %v486_v24 }
 0x251   :  { %496 = vst.msk [vmem:[%s741_s9] sm:$0xff] %vm495_vm3, %v494_v25 }
 0x252   :  { %501 = vsyncpa [#allocation4], 1 }
 0x253   :  { %502 = vsyncpa [#allocation6], 1 }

</bundles_post_ra>
